<compile_context>
chip_gen: v6e
topology: v6e:2x2x1
jax: 0.10.0
libtpu: 0.0.40
codegen_flags: <defaults>
</compile_context>

<pallas_src>
import jax
import jax.numpy as jnp
from jax.experimental import pallas as pl
from jax.experimental.pallas import tpu as pltpu

_LANE = 128


def gated_fusion_kernel(x_ref, y_ref, wx_ref, wy_ref, b_ref, o_ref):
    x = x_ref[...]
    y = y_ref[...]
    # Linear on the (implicit) concat: [x | y] @ [wx ; wy] + b, f32 accumulation.
    z = (jnp.dot(x, wx_ref[...], preferred_element_type=jnp.float32)
         + jnp.dot(y, wy_ref[...], preferred_element_type=jnp.float32)
         + b_ref[...])
    gate = jax.nn.sigmoid(z).astype(x.dtype)
    # out = gate*x + (1-gate)*y  ==  y + gate*(x - y)   (one fewer mul / vreg)
    o_ref[...] = (y + gate * (x - y)).astype(o_ref.dtype)


def _choose_row_tile(M, dim_p, itemsize, sublane, vmem_limit_bytes):
    """Largest row tile keeping double-buffered tiles + resident weights in budget."""
    budget = int(vmem_limit_bytes * 0.85)
    # Two dim_p x dim_p weights + bias; assume worst case of 2 buffers each.
    weight_bytes = 2 * (2 * dim_p * dim_p * itemsize + dim_p * 4)
    # x, y, out tiles, each double-buffered.
    per_row = 2 * 3 * dim_p * itemsize
    tm = (budget - weight_bytes) // per_row
    m_rounded = pl.cdiv(max(M, 1), sublane) * sublane
    tm = max(sublane, min(int(tm), 2048, m_rounded))
    tm = (tm // sublane) * sublane
    return max(tm, sublane)


def gated_fusion(x, y, w, b, *, block_rows=None, vmem_limit_bytes=48 << 20):
    """x, y: (..., dim); w: (dim, 2*dim) in PyTorch layout; b: (dim,)."""
    orig_shape = x.shape
    dim = orig_shape[-1]
    assert y.shape == orig_shape
    assert w.shape == (dim, 2 * dim)

    in_dtype = jnp.dtype(x.dtype)
    itemsize = in_dtype.itemsize
    sublane = 16 if in_dtype == jnp.dtype(jnp.bfloat16) else 8

    # Split / transpose the PyTorch weight so the kernel does two plain matmuls.
    # Weights stay in the input dtype (bf16 weights halve resident VMEM).
    wx = jnp.asarray(w[:, :dim].T, dtype=in_dtype)   # (dim, dim)
    wy = jnp.asarray(w[:, dim:].T, dtype=in_dtype)   # (dim, dim)
    b2 = jnp.asarray(b, dtype=jnp.float32).reshape(1, dim)

    xm = x.reshape(-1, dim)
    ym = y.reshape(-1, dim)
    M = xm.shape[0]

    # Lane-dense feature dim: pad to a multiple of 128.
    # (For dim <= ~2k the padded weights fit VMEM comfortably; the default
    #  module dim=512 uses ~2 MiB f32 per weight.)
    dim_p = pl.cdiv(dim, _LANE) * _LANE

    # Row tile: user override or VMEM-budgeted default (multiple of sublane).
    if block_rows is None:
        tm = _choose_row_tile(M, dim_p, itemsize, sublane, vmem_limit_bytes)
    else:
        tm = int(block_rows)
        assert tm % sublane == 0, f"block_rows must be a multiple of {sublane}"

    grid_m = pl.cdiv(M, tm)
    M_p = grid_m * tm

    # Zero-pad: padded feature columns have zero weights/bias/inputs, so they
    # contribute zero logits and zero outputs; padded rows are sliced off after.
    if dim_p != dim:
        pd = dim_p - dim
        xm = jnp.pad(xm, ((0, 0), (0, pd)))
        ym = jnp.pad(ym, ((0, 0), (0, pd)))
        wx = jnp.pad(wx, ((0, pd), (0, pd)))
        wy = jnp.pad(wy, ((0, pd), (0, pd)))
        b2 = jnp.pad(b2, ((0, 0), (0, pd)))
    if M_p != M:
        pr = M_p - M
        xm = jnp.pad(xm, ((0, pr), (0, 0)))
        ym = jnp.pad(ym, ((0, pr), (0, 0)))

    out = pl.pallas_call(
        gated_fusion_kernel,
        out_shape=jax.ShapeDtypeStruct((M_p, dim_p), x.dtype),
        grid_spec=pltpu.PrefetchScalarGridSpec(
            num_scalar_prefetch=0,
            grid=(grid_m,),
            in_specs=[
                pl.BlockSpec((tm, dim_p), lambda i: (i, 0)),      # x rows
                pl.BlockSpec((tm, dim_p), lambda i: (i, 0)),      # y rows
                pl.BlockSpec((dim_p, dim_p), lambda i: (0, 0)),   # wx (resident)
                pl.BlockSpec((dim_p, dim_p), lambda i: (0, 0)),   # wy (resident)
                pl.BlockSpec((1, dim_p), lambda i: (0, 0)),       # bias (f32)
            ],
            out_specs=pl.BlockSpec((tm, dim_p), lambda i: (i, 0)),
        ),
        compiler_params=pltpu.CompilerParams(
            dimension_semantics=("parallel",),   # shards row tiles across TCs on v7x
            vmem_limit_bytes=vmem_limit_bytes,
        ),
    )(xm, ym, wx, wy, b2)

    return out[:M, :dim].reshape(orig_shape)


def gated_fusion_ref(x, y, w, b):
    concat = jnp.concatenate([x, y], axis=-1)
    gate = jax.nn.sigmoid(concat @ w.T + b)
    return gate * x + (1.0 - gate) * y


if __name__ == "__main__":
    batch, seq, dim = 2, 8, 32

    key = jax.random.PRNGKey(0)
    kx, ky, kw, kb = jax.random.split(key, 4)

    x = jax.random.normal(kx, (batch, seq, dim), dtype=jnp.float32)
    y = jax.random.normal(ky, (batch, seq, dim), dtype=jnp.float32)

    # Deterministic Linear(2*dim, dim) init (PyTorch-style uniform +-1/sqrt(fan_in)).
    fan_in = 2 * dim
    bound = 1.0 / (fan_in ** 0.5)
    w = jax.random.uniform(kw, (dim, 2 * dim), jnp.float32, -bound, bound)
    b = jax.random.uniform(kb, (dim,), jnp.float32, -bound, bound)

    out = gated_fusion(x, y, w, b)
    jax.block_until_ready(out)

    ref = gated_fusion_ref(x, y, w, b)
    assert out.shape == x.shape
    assert jnp.allclose(out, ref, atol=1e-5, rtol=1e-5)

    print("KERNEL_OK")
</pallas_src>

<mosaic_0001>
module attributes {stable_mosaic.version = 11 : i64} {
  func.func @gated_fusion_kernel(%arg0: i32, %arg1: memref<16x128xf32, #tpu.memory_space<vmem>>, %arg2: memref<16x128xf32, #tpu.memory_space<vmem>>, %arg3: memref<128x128xf32, #tpu.memory_space<vmem>>, %arg4: memref<128x128xf32, #tpu.memory_space<vmem>>, %arg5: memref<1x128xf32, #tpu.memory_space<vmem>>, %arg6: memref<16x128xf32, #tpu.memory_space<vmem>>) attributes {dimension_semantics = [#tpu.dimension_semantics<parallel>], iteration_bounds = array<i64: 1>, scalar_prefetch = 0 : i64, scratch_operands = 0 : i64, tpu.core_type = #tpu.core_type<tc>, window_params = [{transform_indices = @transform_0, window_bounds = array<i64: 16, 128>}, {transform_indices = @transform_1, window_bounds = array<i64: 16, 128>}, {pipeline_mode = #tpu.pipeline_mode<synchronous>, transform_indices = @transform_2, window_bounds = array<i64: 128, 128>}, {pipeline_mode = #tpu.pipeline_mode<synchronous>, transform_indices = @transform_3, window_bounds = array<i64: 128, 128>}, {pipeline_mode = #tpu.pipeline_mode<synchronous>, transform_indices = @transform_4, window_bounds = array<i64: 1, 128>}, {transform_indices = @transform_5, window_bounds = array<i64: 16, 128>}]} {
    %c0 = arith.constant 0 : index
    %c0_0 = arith.constant 0 : index
    %0 = vector.load %arg1[%c0, %c0_0] : memref<16x128xf32, #tpu.memory_space<vmem>>, vector<16x128xf32>
    %c0_1 = arith.constant 0 : index
    %c0_2 = arith.constant 0 : index
    %1 = vector.load %arg2[%c0_1, %c0_2] : memref<16x128xf32, #tpu.memory_space<vmem>>, vector<16x128xf32>
    %c0_3 = arith.constant 0 : index
    %c0_4 = arith.constant 0 : index
    %2 = vector.load %arg3[%c0_3, %c0_4] : memref<128x128xf32, #tpu.memory_space<vmem>>, vector<128x128xf32>
    %cst = arith.constant dense<0.000000e+00> : vector<16x128xf32>
    %3 = tpu.matmul %0, %2, %cst {dimension_numbers = #tpu.dot_dimension_numbers<[1], [0], [0], [1], [0, 0, 1, 1], [], []>} : vector<16x128xf32>, vector<128x128xf32>, vector<16x128xf32> -> vector<16x128xf32>
    %c0_5 = arith.constant 0 : index
    %c0_6 = arith.constant 0 : index
    %4 = vector.load %arg4[%c0_5, %c0_6] : memref<128x128xf32, #tpu.memory_space<vmem>>, vector<128x128xf32>
    %cst_7 = arith.constant dense<0.000000e+00> : vector<16x128xf32>
    %5 = tpu.matmul %1, %4, %cst_7 {dimension_numbers = #tpu.dot_dimension_numbers<[1], [0], [0], [1], [0, 0, 1, 1], [], []>} : vector<16x128xf32>, vector<128x128xf32>, vector<16x128xf32> -> vector<16x128xf32>
    %6 = arith.addf %3, %5 : vector<16x128xf32>
    %c0_8 = arith.constant 0 : index
    %c0_9 = arith.constant 0 : index
    %7 = vector.load %arg5[%c0_8, %c0_9] : memref<1x128xf32, #tpu.memory_space<vmem>>, vector<1x128xf32>
    %8 = vector.broadcast %7 : vector<1x128xf32> to vector<16x128xf32>
    %9 = arith.addf %6, %8 : vector<16x128xf32>
    %10 = arith.negf %9 : vector<16x128xf32>
    %11 = math.exp %10 : vector<16x128xf32>
    %cst_10 = arith.constant 1.000000e+00 : f32
    %12 = vector.broadcast %cst_10 : f32 to vector<16x128xf32>
    %13 = arith.addf %12, %11 : vector<16x128xf32>
    %14 = arith.divf %12, %13 : vector<16x128xf32>
    %15 = arith.subf %0, %1 : vector<16x128xf32>
    %16 = arith.mulf %14, %15 : vector<16x128xf32>
    %17 = arith.addf %1, %16 : vector<16x128xf32>
    %c0_11 = arith.constant 0 : index
    %c0_12 = arith.constant 0 : index
    %18 = vector.load %arg6[%c0_11, %c0_12] : memref<16x128xf32, #tpu.memory_space<vmem>>, vector<16x128xf32>
    tpu.vector_store %arg6[%c0_11, %c0_12], %17 {strides = array<i32>} : memref<16x128xf32, #tpu.memory_space<vmem>>, vector<16x128xf32>,
    return
  }
  func.func @transform_0(%arg0: i32) -> (i32, i32) {
    %c0_i32 = arith.constant 0 : i32
    %c0_i32_0 = arith.constant 0 : i32
    return %arg0, %c0_i32 : i32, i32
  }
  func.func @transform_1(%arg0: i32) -> (i32, i32) {
    %c0_i32 = arith.constant 0 : i32
    %c0_i32_0 = arith.constant 0 : i32
    return %arg0, %c0_i32 : i32, i32
  }
  func.func @transform_2(%arg0: i32) -> (i32, i32) {
    %c0_i32 = arith.constant 0 : i32
    %c0_i32_0 = arith.constant 0 : i32
    %c0_i32_1 = arith.constant 0 : i32
    return %c0_i32, %c0_i32_0 : i32, i32
  }
  func.func @transform_3(%arg0: i32) -> (i32, i32) {
    %c0_i32 = arith.constant 0 : i32
    %c0_i32_0 = arith.constant 0 : i32
    %c0_i32_1 = arith.constant 0 : i32
    return %c0_i32, %c0_i32_0 : i32, i32
  }
  func.func @transform_4(%arg0: i32) -> (i32, i32) {
    %c0_i32 = arith.constant 0 : i32
    %c0_i32_0 = arith.constant 0 : i32
    %c0_i32_1 = arith.constant 0 : i32
    return %c0_i32, %c0_i32_0 : i32, i32
  }
  func.func @transform_5(%arg0: i32) -> (i32, i32) {
    %c0_i32 = arith.constant 0 : i32
    %c0_i32_0 = arith.constant 0 : i32
    return %arg0, %c0_i32 : i32, i32
  }
}

</mosaic_0001>

<bundles_post_ra>
// kernel: tpu_custom_call.1
= control target key start
LH: loop header
LB: loop body
LE: loop exit
PB: predicated region body
PF: predicated region fallthrough
CT: control target
= control target key end

     0   :  { %10 = vsyncpa [#allocation3], 0  ;;  %s612_s0 = inlined_call_operand.hbm [shape: f32[16,128], index: 0, kind: input, shape index: {}]   ;;  %s613_s1 = inlined_call_operand.hbm [shape: f32[16,128], index: 1, kind: input, shape index: {}]   ;;  %s614_s2 = inlined_call_operand.hbm [shape: f32[128,128], index: 2, kind: input, shape index: {}]   ;;  %s615_s3 = inlined_call_operand.hbm [shape: f32[128,128], index: 3, kind: input, shape index: {}]   ;;  %s616_s4 = inlined_call_operand.vmem [shape: f32[1,128], index: 4, kind: input, shape index: {}]   ;;  %s617_s5 = inlined_call_operand.hbm [shape: f32[16,128], index: 5, kind: output, shape index: {}]  }
   0x1   :  { %11 = vsyncpa [#allocation6], 0 }
   0x2   :  { %12 = vsyncpa [#allocation9], 0 }
   0x3   :  { %13 = vsyncpa [#allocation4], 0  ;;  %s542_s18 = smov [#allocation5]   ;;  %s543_s20 = smov [#allocation2]  }
   0x4   :  { %s31_s19 = sshll.u32 %s542_s18, 4  ;;  %s19_s21 = sshll.u32 %s543_s20, 4  ;;  %s32_s19 = int_to_ptr.vmem [resolvable:$true] %s31_s19  ;;  %s20_s21 = int_to_ptr.vmem [resolvable:$true] %s19_s21 }
   0x5   :  { %s442_s22 = scalar_lea.vmem %s32_s19, 256  ;;  %p447_p1 = scmp.lt.s32.totalorder %s32_s19, %s32_s19 }
   0x6   :  { %p443_p0 = scmp.ne.s32.totalorder %s32_s19, %s442_s22  ;;  %p448_p2 = scmp.lt.s32.totalorder %s442_s22, %s442_s22 }
   0x8   :  { %p449_p3 = por %p448_p2, %p447_p1 }
   0xa   :  { %p450_p4 = pnand %p449_p3, %p443_p0 }
   0xc   :  { %453 = shalt.err (!%p450_p4)
}
   0xd   :  { %s544_s23 = smov 128   ;;  %s545_s24 = smov 8  }
   0xe   :  { %37 = dma.hbm_to_vmem [thread:$0]  %s613_s1, 256, %s32_s19, [#allocation6], %s544_s23, %s544_s23, %s545_s24  }
   0xf   :  { %s462_s27 = scalar_lea.vmem %s20_s21, 256  ;;  %p467_p6 = scmp.lt.s32.totalorder %s20_s21, %s20_s21 }
  0x10   :  { %p463_p5 = scmp.ne.s32.totalorder %s20_s21, %s462_s27  ;;  %p468_p7 = scmp.lt.s32.totalorder %s462_s27, %s462_s27 }
  0x12   :  { %p469_p8 = por %p468_p7, %p467_p6 }
  0x14   :  { %p470_p9 = pnand %p469_p8, %p463_p5 }
  0x16   :  { %473 = shalt.err (!%p470_p9)
}
  0x17   :  { %25 = dma.hbm_to_vmem [thread:$0]  %s612_s0, 256, %s20_s21, [#allocation3], %s544_s23, %s544_s23, %s545_s24  }
  0x18   :  { %s546_s30 = smov [#allocation7]   ;;  %s547_s7 = smov [#allocation8]  }
  0x19   :  { %s43_s6 = sshll.u32 %s546_s30, 4  ;;  %s55_s8 = sshll.u32 %s547_s7, 4  ;;  %s44_s6 = int_to_ptr.vmem [resolvable:$true] %s43_s6  ;;  %s56_s8 = int_to_ptr.vmem [resolvable:$true] %s55_s8 }
  0x1a   :  { %s482_s1 = scalar_lea.vmem %s44_s6, 2048  ;;  %p487_p11 = scmp.lt.s32.totalorder %s44_s6, %s44_s6 }
  0x1b   :  { %p483_p10 = scmp.ne.s32.totalorder %s44_s6, %s482_s1  ;;  %p488_p12 = scmp.lt.s32.totalorder %s482_s1, %s482_s1 }
  0x1d   :  { %p489_p13 = por %p488_p12, %p487_p11 }
  0x1f   :  { %p490_p0 = pnand %p489_p13, %p483_p10 }
  0x21   :  { %493 = shalt.err (!%p490_p0)
}
  0x22   :  { %49 = dma.hbm_to_vmem [thread:$0]  %s614_s2, 2048, %s44_s6, [#allocation6], %s544_s23, %s544_s23, %s545_s24  }
  0x23   :  { %s502_s0 = scalar_lea.vmem %s56_s8, 2048  ;;  %p507_p2 = scmp.lt.s32.totalorder %s56_s8, %s56_s8 }
  0x24   :  { %p503_p1 = scmp.ne.s32.totalorder %s56_s8, %s502_s0  ;;  %p508_p3 = scmp.lt.s32.totalorder %s502_s0, %s502_s0 }
  0x26   :  { %p509_p4 = por %p508_p3, %p507_p2 }
  0x28   :  { %p510_p5 = pnand %p509_p4, %p503_p1 }
  0x2a   :  { %513 = shalt.err (!%p510_p5)
}
  0x2b   :  { %61 = dma.hbm_to_vmem [thread:$0]  %s615_s3, 2048, %s56_s8, [#allocation9], %s544_s23, %s544_s23, %s545_s24  }
  0x2c   :  { %534 = dma.done.wait [#allocation3], 256  }
  0x2d   :  { %535 = vsyncadd [#allocation3], 4294967040 }
  0x2e   :  { %536 = dma.done.wait [#allocation6], 2304  }
  0x2f   :  { %537 = vsyncadd [#allocation6], 4294964992 }
  0x30   :  { %538 = dma.done.wait [#allocation9], 2048  }
  0x31   :  { %539 = vsyncadd [#allocation9], 4294965248  ;;  %v111_v0 = vld [vmem:[#allocation8 + $0x78] sm:$0xff]  ;;  %v110_v2 = vld [vmem:[#allocation8 + $0x70] sm:$0xff] }
  0x32   :  { %v95_v1 = vld [vmem:[#allocation7 + $0x78] sm:$0xff]  ;;  %349 = vmatprep.subr.mxu0 %v111_v0  ;;  %v94_v3 = vld [vmem:[#allocation7 + $0x70] sm:$0xff]  ;;  %v109_v4 = vld [vmem:[#allocation8 + $0x68] sm:$0xff] }
  0x33   :  { %384 = vmatprep.subr.mxu1 %v95_v1  ;;  %350 = vmatpush3.msra.mxu0 %v111_v0  ;;  %v93_v5 = vld [vmem:[#allocation7 + $0x68] sm:$0xff]  ;;  %v108_v6 = vld [vmem:[#allocation8 + $0x60] sm:$0xff]  ;;  %v107_v8 = vld [vmem:[#allocation8 + $0x58] sm:$0xff] }
  0x34   :  { %385 = vmatpush3.msra.mxu1 %v95_v1  ;;  %351 = vmatprep.subr.mxu0 %v110_v2  ;;  %v92_v7 = vld [vmem:[#allocation7 + $0x60] sm:$0xff]  ;;  %v91_v9 = vld [vmem:[#allocation7 + $0x58] sm:$0xff]  ;;  %v106_v10 = vld [vmem:[#allocation8 + $0x50] sm:$0xff] }
  0x35   :  { %386 = vmatprep.subr.mxu1 %v94_v3  ;;  %352 = vmatpush3.msra.mxu0 %v110_v2  ;;  %v90_v11 = vld [vmem:[#allocation7 + $0x50] sm:$0xff]  ;;  %v105_v12 = vld [vmem:[#allocation8 + $0x48] sm:$0xff]  ;;  %v104_v14 = vld [vmem:[#allocation8 + $0x40] sm:$0xff] }
  0x36   :  { %387 = vmatpush3.msra.mxu1 %v94_v3  ;;  %353 = vmatprep.subr.mxu0 %v109_v4  ;;  %v89_v13 = vld [vmem:[#allocation7 + $0x48] sm:$0xff]  ;;  %v88_v15 = vld [vmem:[#allocation7 + $0x40] sm:$0xff]  ;;  %v103_v16 = vld [vmem:[#allocation8 + $0x38] sm:$0xff] }
  0x37   :  { %388 = vmatprep.subr.mxu1 %v93_v5  ;;  %354 = vmatpush3.msra.mxu0 %v109_v4  ;;  %v87_v17 = vld [vmem:[#allocation7 + $0x38] sm:$0xff]  ;;  %v102_v18 = vld [vmem:[#allocation8 + $0x30] sm:$0xff]  ;;  %v101_v20 = vld [vmem:[#allocation8 + $0x28] sm:$0xff] }
  0x38   :  { %389 = vmatpush3.msra.mxu1 %v93_v5  ;;  %355 = vmatprep.subr.mxu0 %v108_v6  ;;  %v86_v19 = vld [vmem:[#allocation7 + $0x30] sm:$0xff]  ;;  %v85_v21 = vld [vmem:[#allocation7 + $0x28] sm:$0xff]  ;;  %v100_v22 = vld [vmem:[#allocation8 + $0x20] sm:$0xff] }
  0x39   :  { %390 = vmatprep.subr.mxu1 %v92_v7  ;;  %356 = vmatpush3.msra.mxu0 %v108_v6  ;;  %v84_v23 = vld [vmem:[#allocation7 + $0x20] sm:$0xff]  ;;  %v99_v24 = vld [vmem:[#allocation8 + $0x18] sm:$0xff]  ;;  %v98_v26 = vld [vmem:[#allocation8 + $0x10] sm:$0xff] }
  0x3a   :  { %391 = vmatpush3.msra.mxu1 %v92_v7  ;;  %357 = vmatprep.subr.mxu0 %v107_v8  ;;  %v83_v25 = vld [vmem:[#allocation7 + $0x18] sm:$0xff]  ;;  %v82_v27 = vld [vmem:[#allocation7 + $0x10] sm:$0xff]  ;;  %v97_v28 = vld [vmem:[#allocation8 + $0x8] sm:$0xff] }
  0x3b   :  { %392 = vmatprep.subr.mxu1 %v91_v9  ;;  %358 = vmatpush3.msra.mxu0 %v107_v8  ;;  %v81_v29 = vld [vmem:[#allocation7 + $0x8] sm:$0xff]  ;;  %v96_v30 = vld [vmem:[#allocation8] sm:$0xff]  ;;  %v78_v32 = vld [vmem:[#allocation5] sm:$0xff] }
  0x3c   :  { %393 = vmatpush3.msra.mxu1 %v91_v9  ;;  %359 = vmatprep.subr.mxu0 %v106_v10  ;;  %v80_v31 = vld [vmem:[#allocation7] sm:$0xff]  ;;  %v79_v34 = vld [vmem:[#allocation5 + $0x8] sm:$0xff]  ;;  %v77_v35 = vld [vmem:[#allocation2 + $0x8] sm:$0xff] }
  0x3d   :  { %394 = vmatprep.subr.mxu1 %v90_v11  ;;  %360 = vmatpush3.msra.mxu0 %v106_v10  ;;  %v76_v33 = vld [vmem:[#allocation2] sm:$0xff]  ;;  %v284_v51 = vsub.f32 %v77_v35, %v79_v34 }
  0x3e   :  { %395 = vmatpush3.msra.mxu1 %v90_v11  ;;  %361 = vmatprep.subr.mxu0 %v105_v12  ;;  %v310_v38 = vld [vmem:[%s616_s4] ss:$0 sm:$0xff]  ;;  %v283_v52 = vsub.f32 %v76_v33, %v78_v32  ;;  %s548_s4 = smov [#allocation10]  }
  0x3f   :  { %396 = vmatprep.subr.mxu1 %v89_v13  ;;  %362 = vmatpush3.msra.mxu0 %v105_v12  ;;  %s296_s13 = sshll.u32 %s548_s4, 4  ;;  %s297_s13 = int_to_ptr.vmem [resolvable:$true] %s296_s13 }
  0x40   :  { %397 = vmatpush3.msra.mxu1 %v89_v13  ;;  %363 = vmatprep.subr.mxu0 %v104_v14  ;;  %s514_s14 = scalar_lea.vmem %s297_s13, 256  ;;  %p519_p7 = scmp.lt.s32.totalorder %s297_s13, %s297_s13 }
  0x41   :  { %398 = vmatprep.subr.mxu1 %v88_v15  ;;  %364 = vmatpush3.msra.mxu0 %v104_v14  ;;  %p515_p6 = scmp.ne.s32.totalorder %s297_s13, %s514_s14  ;;  %p520_p8 = scmp.lt.s32.totalorder %s514_s14, %s514_s14 }
  0x42   :  { %399 = vmatpush3.msra.mxu1 %v88_v15  ;;  %365 = vmatprep.subr.mxu0 %v103_v16 }
  0x43   :  { %400 = vmatprep.subr.mxu1 %v87_v17  ;;  %366 = vmatpush3.msra.mxu0 %v103_v16  ;;  %p521_p9 = por %p520_p8, %p519_p7 }
  0x44   :  { %401 = vmatpush3.msra.mxu1 %v87_v17  ;;  %367 = vmatprep.subr.mxu0 %v102_v18 }
  0x45   :  { %402 = vmatprep.subr.mxu1 %v86_v19  ;;  %368 = vmatpush3.msra.mxu0 %v102_v18  ;;  %p522_p10 = pnand %p521_p9, %p515_p6 }
  0x46   :  { %403 = vmatpush3.msra.mxu1 %v86_v19  ;;  %369 = vmatprep.subr.mxu0 %v101_v20 }
  0x47   :  { %404 = vmatprep.subr.mxu1 %v85_v21  ;;  %370 = vmatpush3.msra.mxu0 %v101_v20 }
  0x48   :  { %405 = vmatpush3.msra.mxu1 %v85_v21  ;;  %371 = vmatprep.subr.mxu0 %v100_v22 }
  0x49   :  { %406 = vmatprep.subr.mxu1 %v84_v23  ;;  %372 = vmatpush3.msra.mxu0 %v100_v22 }
  0x4a   :  { %407 = vmatpush3.msra.mxu1 %v84_v23  ;;  %373 = vmatprep.subr.mxu0 %v99_v24 }
  0x4b   :  { %408 = vmatprep.subr.mxu1 %v83_v25  ;;  %374 = vmatpush3.msra.mxu0 %v99_v24 }
  0x4c   :  { %409 = vmatpush3.msra.mxu1 %v83_v25  ;;  %375 = vmatprep.subr.mxu0 %v98_v26 }
  0x4d   :  { %410 = vmatprep.subr.mxu1 %v82_v27  ;;  %376 = vmatpush3.msra.mxu0 %v98_v26 }
  0x4e   :  { %411 = vmatpush3.msra.mxu1 %v82_v27  ;;  %377 = vmatprep.subr.mxu0 %v97_v28 }
  0x4f   :  { %412 = vmatprep.subr.mxu1 %v81_v29  ;;  %378 = vmatpush3.msra.mxu0 %v97_v28 }
  0x50   :  { %413 = vmatpush3.msra.mxu1 %v81_v29  ;;  %379 = vmatprep.subr.mxu0 %v96_v30 }
  0x51   :  { %414 = vmatprep.subr.mxu1 %v80_v31  ;;  %380 = vmatpush3.msra.mxu0 %v96_v30 }
  0x52   :  { %381 = vmatprep.mubr.f32.mxu0 %v78_v32  ;;  %415 = vmatpush3.msra.mxu1 %v80_v31 }
  0x53   :  { %416 = vmatprep.mubr.f32.mxu1 %v76_v33  ;;  %382 = vmatmul.mubr.f32.vlgmr.msra.gmra.mxu0 %v79_v34 }
  0x54   :  { %417 = vmatmul.mubr.f32.vlgmr.msra.gmra.mxu1 %v77_v35 }
 0x113   :  { %v383_v36 = vpop.f32.mrf.mxu0 }
 0x114   :  { %v418_v37 = vpop.f32.mrf.mxu1 }
 0x115   :  { %v259_v39 = vadd.f32 %v418_v37, %v383_v36  ;;  %v178_v40 = vpop.f32.mrf.mxu0 }
 0x116   :  { %v253_v41 = vpop.f32.mrf.mxu1 }
 0x117   :  { %v270_v42 = vadd.f32 %v310_v38, %v259_v39  ;;  %v254_v43 = vadd.f32 %v253_v41, %v178_v40 }
 0x119   :  { %v312_v44 = vmul.f32 -1.442695, %v270_v42  ;;  %v269_v45 = vadd.f32 %v310_v38, %v254_v43 }
 0x11b   :  { %426 = vpow2.f32 %v312_v44  ;;  %v311_v46 = vmul.f32 -1.442695, %v269_v45 }
 0x11d   :  { %428 = vpow2.f32 %v311_v46 }
 0x128   :  { %v427_v47 = vpop.eup %426 }
 0x129   :  { %v278_v48 = vadd.f32 1.0, %v427_v47 }
 0x12a   :  { %v429_v49 = vpop.eup %428 }
 0x12b   :  { %430 = vrcp.f32 %v278_v48  ;;  %v277_v50 = vadd.f32 1.0, %v429_v49 }
 0x12d   :  { %432 = vrcp.f32 %v277_v50 }
 0x138   :  { %v431_v53 = vpop.eup %430 }
 0x139   :  { %v286_v54 = vmul.f32 %v431_v53, %v284_v51 }
 0x13a   :  { %v433_v55 = vpop.eup %432 }
 0x13b   :  { %v285_v56 = vmul.f32 %v433_v55, %v283_v52  ;;  %v288_v57 = vadd.f32 %v286_v54, %v79_v34 }
 0x13d   :  { %v287_v58 = vadd.f32 %v285_v56, %v78_v32  ;;  %290 = vst [vmem:[#allocation10 + $0x8] sm:$0xff] %v288_v57 }
 0x13f   :  { %289 = vst [vmem:[#allocation10] sm:$0xff] %v287_v58 }
 0x140   :  { %525 = shalt.err (!%p522_p10)
}
 0x141   :  { %302 = dma.vmem_to_hbm [thread:$0]  %s297_s13, 256, %s617_s5, [#allocation4], %s544_s23, %s544_s23, %s545_s24  }
 0x142   :  { %540 = dma.done.wait [#allocation4], 256  }
 0x143   :  { %541 = vsyncadd [#allocation4], 4294967040 }
 0x144   :  { %306 = vsyncpa [#allocation3], 1 }
 0x145   :  { %307 = vsyncpa [#allocation6], 1 }
 0x146   :  { %308 = vsyncpa [#allocation9], 1 }
 0x147   :  { %309 = vsyncpa [#allocation4], 1 }

</bundles_post_ra>
